<compile_context>
chip_gen: v7x
topology: tpu7x:2x2x1
jax: 0.10.0
libtpu: 0.0.40
codegen_flags: <defaults>
</compile_context>

<pallas_src>
import jax
import jax.numpy as jnp
from jax.experimental import pallas as pl
from jax.experimental.pallas import tpu as pltpu

_BN_EPS = 1e-5


def _identity_block_kernel(x_ref, w1_ref, w2_ref, w3_ref, t_ref, o_ref):
    """Fused 1x1-conv chain + folded BN + ReLU + residual add + ReLU.

    x_ref : [C, T]   input tile, f32 (channels on sublanes, spatial on lanes)
    w*_ref: [C, C]   bf16, laid out [Cout, Cin] with BN scale pre-folded in
    t_ref : [C, 3]   f32 per-channel shifts (columns: t1, t2, t3)
    o_ref : [C, T]
    """
    x = x_ref[...]                       # f32, kept for the residual add
    xb = x.astype(jnp.bfloat16)

    # conv1 + bn1 + relu   (bf16 MXU operands, f32 accumulation)
    h = jnp.dot(w1_ref[...], xb, preferred_element_type=jnp.float32)
    h = jnp.maximum(h + t_ref[:, 0:1], 0.0)

    # conv2 + bn2 + relu
    h = jnp.dot(w2_ref[...], h.astype(jnp.bfloat16),
                preferred_element_type=jnp.float32)
    h = jnp.maximum(h + t_ref[:, 1:2], 0.0)

    # conv3 + bn3
    h = jnp.dot(w3_ref[...], h.astype(jnp.bfloat16),
                preferred_element_type=jnp.float32)
    h = h + t_ref[:, 2:3]

    # residual add + relu
    o_ref[...] = jnp.maximum(h + x, 0.0).astype(o_ref.dtype)


def _pick_tile_hw(hw, max_tile=2048):
    """Largest spatial tile <= max_tile that tiles H*W with 128-multiple lanes."""
    if hw <= max_tile:
        return hw
    for t in range(max_tile - max_tile % 128, 0, -128):
        if hw % t == 0:
            return t
    return hw  # fall back to the full spatial extent


def _fold_params(params):
    """Fold conv bias + eval-mode BN into the weights / a per-channel shift.

    y = ((x @ W) + b - mean) * gamma/sqrt(var+eps) + beta
      = x @ (W * s) + t,   s = gamma/sqrt(var+eps),  t = (b - mean) * s + beta
    Returned weights are transposed to [Cout, Cin] (for W^T @ x) and cast to
    bf16 so the MXU runs at its native bf16 rate.
    """
    def fold(w, b, gamma, beta, mean, var):
        s = gamma / jnp.sqrt(var + _BN_EPS)
        t = (b - mean) * s + beta
        wt = (w * s[None, :]).T            # [Cout, Cin], scale folded in
        return wt.astype(jnp.bfloat16), t.astype(jnp.float32)

    w1t, t1 = fold(params["w1"], params["b1"], *params["bn1"])
    w2t, t2 = fold(params["w2"], params["b2"], *params["bn2"])
    w3t, t3 = fold(params["w3"], params["b3"], *params["bn3"])
    tb = jnp.stack([t1, t2, t3], axis=1)   # [C, 3]
    return w1t, w2t, w3t, tb


def resnet_identity_block(x_nchw, params, *, tile_hw=None):
    """x_nchw: [B, C, H, W] float32.  Returns [B, C, H, W]."""
    B, C, H, W = x_nchw.shape
    hw = H * W

    w1t, w2t, w3t, tb = _fold_params(params)

    if tile_hw is None:
        tile_hw = _pick_tile_hw(hw)
    assert hw % tile_hw == 0, "H*W must be divisible by tile_hw"

    x3 = x_nchw.reshape(B, C, hw)          # no transpose: free view

    # VMEM budget: x/out tiles (double-buffered) + resident bf16 weights.
    est_vmem = 2 * 2 * (C * tile_hw * 4) + 2 * 3 * (C * C * 2) + 4 * C * 8
    cp_kwargs = dict(dimension_semantics=("parallel", "parallel"))
    if est_vmem > 32 * 1024 * 1024:        # raise scoped limit only if needed
        cp_kwargs["vmem_limit_bytes"] = min(int(est_vmem * 1.25),
                                            48 * 1024 * 1024)

    out3 = pl.pallas_call(
        _identity_block_kernel,
        out_shape=jax.ShapeDtypeStruct((B, C, hw), x_nchw.dtype),
        grid_spec=pltpu.PrefetchScalarGridSpec(
            num_scalar_prefetch=0,
            grid=(B, hw // tile_hw),
            in_specs=[
                pl.BlockSpec((None, C, tile_hw), lambda b, j: (b, 0, j)),  # x
                pl.BlockSpec((C, C), lambda b, j: (0, 0)),                 # W1^T
                pl.BlockSpec((C, C), lambda b, j: (0, 0)),                 # W2^T
                pl.BlockSpec((C, C), lambda b, j: (0, 0)),                 # W3^T
                pl.BlockSpec((C, 3), lambda b, j: (0, 0)),                 # shifts
            ],
            out_specs=pl.BlockSpec((None, C, tile_hw), lambda b, j: (b, 0, j)),
        ),
        compiler_params=pltpu.CompilerParams(**cp_kwargs),
    )(x3, w1t, w2t, w3t, tb)

    return out3.reshape(B, C, H, W)


def make_params(key, c_in, c_out):
    # Identity block requires c_in == c_out for the residual add.
    assert c_in == c_out
    ks = jax.random.split(key, 20)
    scale = 0.1

    def conv_w(k):
        # stored as [Cin, Cout]
        return scale * jax.random.normal(k, (c_in, c_out), jnp.float32)

    def bn(kg, kb, km, kv):
        gamma = 1.0 + 0.1 * jax.random.normal(kg, (c_out,), jnp.float32)
        beta = 0.1 * jax.random.normal(kb, (c_out,), jnp.float32)
        mean = 0.1 * jax.random.normal(km, (c_out,), jnp.float32)
        var = jnp.abs(jax.random.normal(kv, (c_out,), jnp.float32)) + 0.5
        return gamma, beta, mean, var

    return {
        "w1": conv_w(ks[0]),
        "b1": 0.1 * jax.random.normal(ks[1], (c_out,), jnp.float32),
        "bn1": bn(ks[2], ks[3], ks[4], ks[5]),
        "w2": conv_w(ks[6]),
        "b2": 0.1 * jax.random.normal(ks[7], (c_out,), jnp.float32),
        "bn2": bn(ks[8], ks[9], ks[10], ks[11]),
        "w3": conv_w(ks[12]),
        "b3": 0.1 * jax.random.normal(ks[13], (c_out,), jnp.float32),
        "bn3": bn(ks[14], ks[15], ks[16], ks[17]),
    }


def _reference_f32(x_nchw, params):
    """Pure-JAX f32 reference with eval-mode BN (original module semantics)."""
    B, C, H, W = x_nchw.shape
    x = jnp.transpose(x_nchw, (0, 2, 3, 1)).reshape(-1, C)

    def convbnrelu(h, w, b, bn_p, relu):
        gamma, beta, mean, var = bn_p
        y = h @ w + b
        y = (y - mean) / jnp.sqrt(var + _BN_EPS) * gamma + beta
        return jnp.maximum(y, 0.0) if relu else y

    h = convbnrelu(x, params["w1"], params["b1"], params["bn1"], True)
    h = convbnrelu(h, params["w2"], params["b2"], params["bn2"], True)
    h = convbnrelu(h, params["w3"], params["b3"], params["bn3"], False)
    out = jnp.maximum(h + x, 0.0)
    return jnp.transpose(out.reshape(B, H, W, C), (0, 3, 1, 2))


def _reference_matched(x_nchw, params):
    """Pure-JAX reference on the same arithmetic path as the kernel
    (folded BN, bf16 matmul operands, f32 accumulation)."""
    B, C, H, W = x_nchw.shape
    x3 = x_nchw.reshape(B, C, H * W)
    w1t, w2t, w3t, tb = _fold_params(params)

    def mm(wt, h):
        return jnp.einsum("oc,bcs->bos", wt, h.astype(jnp.bfloat16),
                          preferred_element_type=jnp.float32)

    h = jnp.maximum(mm(w1t, x3) + tb[None, :, 0:1], 0.0)
    h = jnp.maximum(mm(w2t, h) + tb[None, :, 1:2], 0.0)
    h = mm(w3t, h) + tb[None, :, 2:3]
    out = jnp.maximum(h + x3, 0.0)
    return out.reshape(B, C, H, W)


if __name__ == "__main__":
    key = jax.random.PRNGKey(0)
    k_x, k_p = jax.random.split(key)

    B, C, H, W = 2, 32, 16, 16            # in_channels == out_channels == 32
    x = jax.random.normal(k_x, (B, C, H, W), jnp.float32)
    params = make_params(k_p, C, C)

    out = jax.jit(resnet_identity_block)(x, params)
    out = jax.block_until_ready(out)
    assert out.shape == (B, C, H, W)

    # Tight check against a reference using the same bf16/f32 arithmetic path.
    ref_m = _reference_matched(x, params)
    err_m = float(jnp.max(jnp.abs(out - ref_m)))
    assert jnp.allclose(out, ref_m, atol=2e-3, rtol=2e-3), (
        "mismatch vs precision-matched reference, max abs err %.3e" % err_m)

    # Semantic check against the full-f32 eval-mode BN reference
    # (loose tolerance accounts for the bf16 MXU operands).
    ref_f = _reference_f32(x, params)
    err_f = float(jnp.max(jnp.abs(out - ref_f)))
    assert jnp.allclose(out, ref_f, atol=5e-2, rtol=5e-2), (
        "mismatch vs f32 reference, max abs err %.3e" % err_f)

    print("KERNEL_OK")
</pallas_src>

<mosaic_0001>
module attributes {stable_mosaic.version = 11 : i64} {
  func.func @_identity_block_kernel(%arg0: i32, %arg1: i32, %arg2: memref<1x32x256xf32, #tpu.memory_space<vmem>>, %arg3: memref<32x32xbf16, #tpu.memory_space<vmem>>, %arg4: memref<32x32xbf16, #tpu.memory_space<vmem>>, %arg5: memref<32x32xbf16, #tpu.memory_space<vmem>>, %arg6: memref<32x3xf32, #tpu.memory_space<vmem>>, %arg7: memref<1x32x256xf32, #tpu.memory_space<vmem>>) attributes {dimension_semantics = [#tpu.dimension_semantics<parallel>, #tpu.dimension_semantics<parallel>], iteration_bounds = array<i64: 2, 1>, scalar_prefetch = 0 : i64, scratch_operands = 0 : i64, tpu.core_type = #tpu.core_type<tc>, window_params = [{transform_indices = @transform_0, window_bounds = array<i64: 1, 32, 256>}, {pipeline_mode = #tpu.pipeline_mode<synchronous>, transform_indices = @transform_1, window_bounds = array<i64: 32, 32>}, {pipeline_mode = #tpu.pipeline_mode<synchronous>, transform_indices = @transform_2, window_bounds = array<i64: 32, 32>}, {pipeline_mode = #tpu.pipeline_mode<synchronous>, transform_indices = @transform_3, window_bounds = array<i64: 32, 32>}, {pipeline_mode = #tpu.pipeline_mode<synchronous>, transform_indices = @transform_4, window_bounds = array<i64: 32, 3>}, {transform_indices = @transform_5, window_bounds = array<i64: 1, 32, 256>}]} {
    %c0 = arith.constant 0 : index
    %c0_0 = arith.constant 0 : index
    %c0_1 = arith.constant 0 : index
    %0 = vector.load %arg2[%c0, %c0_0, %c0_1] : memref<1x32x256xf32, #tpu.memory_space<vmem>>, vector<1x32x256xf32>
    %1 = vector.shape_cast %0 : vector<1x32x256xf32> to vector<32x256xf32>
    %2 = arith.truncf %1 : vector<32x256xf32> to vector<32x256xbf16>
    %c0_2 = arith.constant 0 : index
    %c0_3 = arith.constant 0 : index
    %3 = vector.load %arg3[%c0_2, %c0_3] : memref<32x32xbf16, #tpu.memory_space<vmem>>, vector<32x32xbf16>
    %cst = arith.constant dense<0.000000e+00> : vector<32x256xf32>
    %4 = tpu.matmul %3, %2, %cst {dimension_numbers = #tpu.dot_dimension_numbers<[1], [0], [0], [1], [0, 0, 1, 1], [], []>} : vector<32x32xbf16>, vector<32x256xbf16>, vector<32x256xf32> -> vector<32x256xf32>
    %c0_4 = arith.constant 0 : index
    %c0_5 = arith.constant 0 : index
    %5 = vector.load %arg6[%c0_4, %c0_5] : memref<32x3xf32, #tpu.memory_space<vmem>>, vector<32x1xf32>
    %6 = vector.broadcast %5 : vector<32x1xf32> to vector<32x256xf32>
    %7 = arith.addf %4, %6 : vector<32x256xf32>
    %cst_6 = arith.constant 0.000000e+00 : f32
    %8 = vector.broadcast %cst_6 : f32 to vector<32x256xf32>
    %9 = arith.maximumf %7, %8 : vector<32x256xf32>
    %c0_7 = arith.constant 0 : index
    %c0_8 = arith.constant 0 : index
    %10 = vector.load %arg4[%c0_7, %c0_8] : memref<32x32xbf16, #tpu.memory_space<vmem>>, vector<32x32xbf16>
    %11 = arith.truncf %9 : vector<32x256xf32> to vector<32x256xbf16>
    %cst_9 = arith.constant dense<0.000000e+00> : vector<32x256xf32>
    %12 = tpu.matmul %10, %11, %cst_9 {dimension_numbers = #tpu.dot_dimension_numbers<[1], [0], [0], [1], [0, 0, 1, 1], [], []>} : vector<32x32xbf16>, vector<32x256xbf16>, vector<32x256xf32> -> vector<32x256xf32>
    %c0_10 = arith.constant 0 : index
    %c1 = arith.constant 1 : index
    %13 = vector.load %arg6[%c0_10, %c1] : memref<32x3xf32, #tpu.memory_space<vmem>>, vector<32x1xf32>
    %14 = vector.broadcast %13 : vector<32x1xf32> to vector<32x256xf32>
    %15 = arith.addf %12, %14 : vector<32x256xf32>
    %cst_11 = arith.constant 0.000000e+00 : f32
    %16 = vector.broadcast %cst_11 : f32 to vector<32x256xf32>
    %17 = arith.maximumf %15, %16 : vector<32x256xf32>
    %c0_12 = arith.constant 0 : index
    %c0_13 = arith.constant 0 : index
    %18 = vector.load %arg5[%c0_12, %c0_13] : memref<32x32xbf16, #tpu.memory_space<vmem>>, vector<32x32xbf16>
    %19 = arith.truncf %17 : vector<32x256xf32> to vector<32x256xbf16>
    %cst_14 = arith.constant dense<0.000000e+00> : vector<32x256xf32>
    %20 = tpu.matmul %18, %19, %cst_14 {dimension_numbers = #tpu.dot_dimension_numbers<[1], [0], [0], [1], [0, 0, 1, 1], [], []>} : vector<32x32xbf16>, vector<32x256xbf16>, vector<32x256xf32> -> vector<32x256xf32>
    %c0_15 = arith.constant 0 : index
    %c2 = arith.constant 2 : index
    %21 = vector.load %arg6[%c0_15, %c2] : memref<32x3xf32, #tpu.memory_space<vmem>>, vector<32x1xf32>
    %22 = vector.broadcast %21 : vector<32x1xf32> to vector<32x256xf32>
    %23 = arith.addf %20, %22 : vector<32x256xf32>
    %24 = arith.addf %23, %1 : vector<32x256xf32>
    %cst_16 = arith.constant 0.000000e+00 : f32
    %25 = vector.broadcast %cst_16 : f32 to vector<32x256xf32>
    %26 = arith.maximumf %24, %25 : vector<32x256xf32>
    %c0_17 = arith.constant 0 : index
    %c0_18 = arith.constant 0 : index
    %c0_19 = arith.constant 0 : index
    %27 = vector.load %arg7[%c0_17, %c0_18, %c0_19] : memref<1x32x256xf32, #tpu.memory_space<vmem>>, vector<1x32x256xf32>
    %28 = vector.shape_cast %27 : vector<1x32x256xf32> to vector<32x256xf32>
    %29 = vector.shape_cast %26 : vector<32x256xf32> to vector<1x32x256xf32>
    tpu.vector_store %arg7[%c0_17, %c0_18, %c0_19], %29 {strides = array<i32>} : memref<1x32x256xf32, #tpu.memory_space<vmem>>, vector<1x32x256xf32>,
    return
  }
  func.func @transform_0(%arg0: i32, %arg1: i32) -> (i32, i32, i32) {
    %c0_i32 = arith.constant 0 : i32
    %c0_i32_0 = arith.constant 0 : i32
    return %arg0, %c0_i32, %arg1 : i32, i32, i32
  }
  func.func @transform_1(%arg0: i32, %arg1: i32) -> (i32, i32) {
    %c0_i32 = arith.constant 0 : i32
    %c0_i32_0 = arith.constant 0 : i32
    %c0_i32_1 = arith.constant 0 : i32
    return %c0_i32, %c0_i32_0 : i32, i32
  }
  func.func @transform_2(%arg0: i32, %arg1: i32) -> (i32, i32) {
    %c0_i32 = arith.constant 0 : i32
    %c0_i32_0 = arith.constant 0 : i32
    %c0_i32_1 = arith.constant 0 : i32
    return %c0_i32, %c0_i32_0 : i32, i32
  }
  func.func @transform_3(%arg0: i32, %arg1: i32) -> (i32, i32) {
    %c0_i32 = arith.constant 0 : i32
    %c0_i32_0 = arith.constant 0 : i32
    %c0_i32_1 = arith.constant 0 : i32
    return %c0_i32, %c0_i32_0 : i32, i32
  }
  func.func @transform_4(%arg0: i32, %arg1: i32) -> (i32, i32) {
    %c0_i32 = arith.constant 0 : i32
    %c0_i32_0 = arith.constant 0 : i32
    %c0_i32_1 = arith.constant 0 : i32
    return %c0_i32, %c0_i32_0 : i32, i32
  }
  func.func @transform_5(%arg0: i32, %arg1: i32) -> (i32, i32, i32) {
    %c0_i32 = arith.constant 0 : i32
    %c0_i32_0 = arith.constant 0 : i32
    return %arg0, %c0_i32, %arg1 : i32, i32, i32
  }
}

</mosaic_0001>

<bundles_post_ra>
// kernel: resnet_identity_block.1
= control target key start
LH: loop header
LB: loop body
LE: loop exit
PB: predicated region body
PF: predicated region fallthrough
CT: control target
= control target key end

     0   :  { %s813_s18 = smov 0   ;;  %s815_s19 = smov 0   ;;  %s959_s0 = inlined_call_operand.vmem [shape: f32[2,32,256], index: 0, kind: input, shape index: {}]   ;;  %s960_s1 = inlined_call_operand.vmem [shape: bf16[32,32], index: 1, kind: input, shape index: {}]   ;;  %s961_s2 = inlined_call_operand.vmem [shape: bf16[32,32], index: 2, kind: input, shape index: {}]   ;;  %s962_s3 = inlined_call_operand.vmem [shape: bf16[32,32], index: 3, kind: input, shape index: {}]   ;;  %s963_s4 = inlined_call_operand.vmem [shape: f32[32,3], index: 4, kind: input, shape index: {}]   ;;  %s964_s5 = inlined_call_operand.vmem [shape: f32[2,32,256], index: 5, kind: output, shape index: {}]  }
   0x1   :  { %s817_s20 = smov 0  }
   0x2 LB: > { %s27_s21 = sadd.s32 1, %s774_s19  ;;  %p692_p0 = scmp.ge.s32.totalorder %s778_s20, 1  ;;  %s778_s20 = sphi %s817_s20, %s15_s20   ;;  %s774_s19 = sphi %s815_s19, %s966_s19   ;;  %s770_s18 = sphi %s813_s18, %s965_s18  }
   0x3   : > { %p29_p1 = scmp.ge.s32.totalorder %s27_s21, 2  ;;  %p208_p2 = scmp.lt.s32.totalorder %s778_s20, 3 }
   0x5   : > { %s968_s21 = smov (%p29_p1, %s27_s21), 0  ;;  %p209_p3 = pnand %p692_p0, %p208_p2 }
   0x6   : > { %p245_p4 = scmp.lt.s32.totalorder (!%p209_p3), %s770_s18, 1  ;;  %v780_v0 = vmov (!%p209_p3), 0   ;;  %v839_v1 = vld [vmem:[%s963_s4] sm:$0xff] (!%p209_p3)  ;;  %v845_v2 = vld [vmem:[%s963_s4 + $0x10] sm:$0xff] (!%p209_p3)  ;;  %v852_v3 = vld [vmem:[%s963_s4 + $0x8] sm:$0xff] (!%p209_p3)  ;;  %vm315_vm0 = vcmask (!%p209_p3), 261120  }
   0x7   : > { %212 = sbr.rel (%p209_p3) target bundleno = 720 (0x2d0), region = 40  ;;  %354 = vmatprep.mubr.bf16.mxu0 (!%p209_p3), %v780_v0  ;;  %364 = vmatprep.mubr.bf16.mxu1 (!%p209_p3), %v780_v0  ;;  %v858_v4 = vld [vmem:[%s963_s4 + $0x18] sm:$0xff] (!%p209_p3)  ;;  %v750_v17 = vld [vmem:[%s960_s1] sm:$0xff] (!%p209_p3)   ;;  %v751_v18 = vld [vmem:[%s960_s1 + $0x8] sm:$0xff] (!%p209_p3)   ;;  %v781_v19 = vmov (!%p209_p3), 1   ;;  %v782_v54 = vmov (!%p209_p3), 2  }
   0x8   : > { %744 = vset.pattern.permute.xlu0 (!%p209_p3), %v780_v0  ;;  %745 = vset.pattern.permute.xlu1 (!%p209_p3), %v780_v0  ;;  %v752_v52 = vld [vmem:[%s961_s2] sm:$0xff] (!%p209_p3)   ;;  %v753_v53 = vld [vmem:[%s961_s2 + $0x8] sm:$0xff] (!%p209_p3)  }
   0x9   : > { %287 = vperm.xlu0 (!%p209_p3), %744, %v839_v1   ;;  %297 = vperm.xlu1 (!%p209_p3), %745, %v845_v2  }
   0xd   : > { %292 = vperm.xlu0 (!%p209_p3), %744, %v852_v3   ;;  %302 = vperm.xlu1 (!%p209_p3), %745, %v858_v4  }
   0xe   : > { %s970_s18 = smov (!%p245_p4, %s770_s18), 1 }
   0xf   : > { %s711_s28 = sshll.u32 %s970_s18, 6 }
  0x10   : > { %s252_s8 = scalar_lea.vmem %s959_s0, %s711_s28  ;;  %s933_s27 = scalar_lea.vmem %s964_s5, %s711_s28 }
  0x11   : > { %v865_v5 = vld [vmem:[%s252_s8 + $0x8] sm:$0xff]  ;;  %v867_v6 = vld [vmem:[%s252_s8 + $0x18] sm:$0xff]  ;;  %v869_v7 = vld [vmem:[%s252_s8] sm:$0xff]  ;;  %746 = vset.pattern.permute.xlu0 %v781_v19  ;;  %747 = vset.pattern.permute.xlu1 %v781_v19 }
  0x12   : > { %v274_v8 = vpack.c.bf16 %v867_v6, %v865_v5  ;;  %v873_v9 = vld [vmem:[%s252_s8 + $0x10] sm:$0xff]  ;;  %v875_v10 = vld [vmem:[%s252_s8 + $0x28] sm:$0xff]  ;;  %v877_v11 = vld [vmem:[%s252_s8 + $0x38] sm:$0xff]  ;;  %392 = vperm.xlu0 %746, %v839_v1   ;;  %396 = vperm.xlu1 %747, %v852_v3  }
  0x13   : > { %v273_v12 = vpack.c.bf16 %v873_v9, %v869_v7  ;;  %v276_v13 = vpack.c.bf16 %v877_v11, %v875_v10  ;;  %v885_v14 = vld [vmem:[%s252_s8 + $0x20] sm:$0xff]  ;;  %v887_v15 = vld [vmem:[%s252_s8 + $0x30] sm:$0xff] }
  0x14   : > { %322 = vmatprep.subr.bf16.mxu0 %v274_v8  ;;  %713 = vmatprep.subr.bf16.mxu1 %v274_v8  ;;  %v275_v16 = vpack.c.bf16 %v887_v15, %v885_v14 }
  0x15   : > { %323 = vmatpush1.bf16.msra.mxu0 %v273_v12  ;;  %715 = vmatpush1.bf16.msra.mxu1 %v273_v12 }
  0x16   : > { %324 = vmatprep.subr.bf16.mxu0 %v276_v13  ;;  %714 = vmatprep.subr.bf16.mxu1 %v276_v13 }
  0x17   : > { %400 = vperm.xlu1 %747, %v845_v2   ;;  %404 = vperm.xlu0 %746, %v858_v4  }
  0x19   : > { %325 = vmatpush1.bf16.msra.mxu0 %v275_v16  ;;  %716 = vmatpush1.bf16.msra.mxu1 %v275_v16 }
  0x1b   : > { %748 = vset.pattern.permute.xlu1 %v782_v54  ;;  %749 = vset.pattern.permute.xlu0 %v782_v54 }
  0x1c   : > { %699 = vmatmul.mubr.msk.bf16.vlgmr.msra.gmra.mrb[0].mxu0 %vm315_vm0, %v750_v17  ;;  %700 = vmatmul.mubr.msk.bf16.vlgmr.msra.gmra.mrb[0].mxu1 %vm315_vm0, %v751_v18 }
  0x1d   : > { %455 = vmatprep.mubr.bf16.mxu1 %v780_v0  ;;  %556 = vmatprep.mubr.bf16.mxu0 %v780_v0 }
  0x1e   : > { %493 = vperm.xlu1 %748, %v839_v1   ;;  %497 = vperm.xlu0 %749, %v852_v3  }
  0x22   : > { %501 = vperm.xlu1 %748, %v845_v2  }
  0x26   : > { %505 = vperm.xlu1 %748, %v858_v4  }
  0x88   : > { %v288_v20 = vpop.permute.xlu0 %287  ;;  %v298_v21 = vpop.permute.xlu1 %297 }
  0x8c   : > { %v293_v22 = vpop.permute.xlu0 %292  ;;  %v303_v23 = vpop.permute.xlu1 %302 }
  0x91   : > { %v393_v55 = vpop.permute.xlu0 %392  ;;  %v397_v57 = vpop.permute.xlu1 %396 }
  0x96   : > { %v401_v17 = vpop.permute.xlu1 %400 }
  0xef   : > { %v356_v24 = vpop.f32.mrb[0].mxu0  ;;  %v366_v25 = vpop.f32.mrb[0].mxu1 }
  0xf0   : > { %v357_v26 = vadd.f32 %v356_v24, %v288_v20  ;;  %v367_v27 = vadd.f32 %v366_v25, %v298_v21  ;;  %v358_v28 = vpop.f32.mrb[1].mxu0  ;;  %v368_v29 = vpop.f32.mrb[1].mxu1 }
  0xf1   : > { %v359_v30 = vadd.f32 %v358_v28, %v288_v20  ;;  %v369_v31 = vadd.f32 %v368_v29, %v298_v21  ;;  %v360_v32 = vpop.f32.mrb[2].mxu0  ;;  %v370_v33 = vpop.f32.mrb[2].mxu1 }
  0xf2   : > { %v379_v34 = vmax.f32 %v367_v27, 0.0  ;;  %v361_v35 = vadd.f32 %v360_v32, %v293_v22  ;;  %v371_v36 = vadd.f32 %v370_v33, %v303_v23  ;;  %v362_v37 = vpop.f32.mrb[3].mxu0  ;;  %v372_v38 = vpop.f32.mrb[3].mxu1  ;;  %v375_v42 = vmax.f32 %v357_v26, 0.0  ;;  %v754_v32 = vld [vmem:[%s962_s3] sm:$0xff]   ;;  %v755_v33 = vld [vmem:[%s962_s3 + $0x8] sm:$0xff]  }
  0xf3   : > { %v380_v39 = vmax.f32 %v369_v31, 0.0  ;;  %v363_v40 = vadd.f32 %v362_v37, %v293_v22  ;;  %v373_v41 = vadd.f32 %v372_v38, %v303_v23  ;;  %v376_v45 = vmax.f32 %v359_v30, 0.0  ;;  %v405_v20 = vpop.permute.xlu0 %404 }
  0xf4   : > { %v377_v43 = vmax.f32 %v361_v35, 0.0  ;;  %v381_v44 = vmax.f32 %v371_v36, 0.0 }
  0xf5   : > { %v378_v46 = vmax.f32 %v363_v40, 0.0  ;;  %v382_v47 = vmax.f32 %v373_v41, 0.0 }
  0xf6   : > { %v387_v48 = vpack.c.bf16 %v377_v43, %v375_v42  ;;  %v389_v49 = vpack.c.bf16 %v381_v44, %v379_v34  ;;  %v494_v34 = vpop.permute.xlu1 %493 }
  0xf7   : > { %v388_v50 = vpack.c.bf16 %v378_v46, %v376_v45  ;;  %v390_v51 = vpack.c.bf16 %v382_v47, %v380_v39  ;;  %v498_v36 = vpop.permute.xlu0 %497 }
  0xf9   : > { %423 = vmatprep.subr.bf16.mxu1 %v388_v50 }
  0xfa   : > { %424 = vmatpush1.bf16.msra.mxu1 %v387_v48 }
  0xfb   : > { %425 = vmatprep.subr.bf16.mxu1 %v390_v51 }
  0xfe   : > { %426 = vmatpush1.bf16.msra.mxu1 %v389_v49 }
 0x101   : > { %703 = vmatmul.mubr.msk.bf16.vlgmr.msra.gmra.mrb[4].mxu1 %vm315_vm0, %v752_v52 }
 0x102   : > { %465 = vmatprep.mubr.bf16.mxu1 %v780_v0 }
 0x109   : > { %704 = vmatmul.mubr.msk.bf16.gmra.mrb[8].mxu1 %vm315_vm0, %v753_v53 }
 0x1d4   : > { %v457_v56 = vpop.f32.mrb[4].mxu1 }
 0x1d5   : > { %v458_v58 = vadd.f32 %v457_v56, %v393_v55  ;;  %v459_v59 = vpop.f32.mrb[5].mxu1 }
 0x1d6   : > { %v460_v60 = vadd.f32 %v459_v59, %v393_v55  ;;  %v461_v61 = vpop.f32.mrb[6].mxu1 }
 0x1d7   : > { %v462_v62 = vadd.f32 %v461_v61, %v397_v57  ;;  %v463_v63 = vpop.f32.mrb[7].mxu1  ;;  %v476_v12 = vmax.f32 %v458_v58, 0.0 }
 0x1d8   : > { %v464_v8 = vadd.f32 %v463_v63, %v397_v57  ;;  %v477_v16 = vmax.f32 %v460_v60, 0.0 }
 0x1d9   : > { %v478_v13 = vmax.f32 %v462_v62, 0.0 }
 0x1da   : > { %v479_v1 = vmax.f32 %v464_v8, 0.0 }
 0x1db   : > { %v488_v3 = vpack.c.bf16 %v478_v13, %v476_v12 }
 0x1dc   : > { %v489_v18 = vpack.c.bf16 %v479_v1, %v477_v16  ;;  %v467_v2 = vpop.f32.mrb[8].mxu1 }
 0x1dd   : > { %v468_v19 = vadd.f32 %v467_v2, %v401_v17  ;;  %v469_v4 = vpop.f32.mrb[9].mxu1 }
 0x1de   : > { %v470_v21 = vadd.f32 %v469_v4, %v401_v17  ;;  %v471_v22 = vpop.f32.mrb[10].mxu1  ;;  %524 = vmatprep.subr.bf16.mxu0 %v489_v18 }
 0x1df   : > { %v472_v23 = vadd.f32 %v471_v22, %v405_v20  ;;  %v473_v24 = vpop.f32.mrb[11].mxu1  ;;  %525 = vmatpush1.bf16.msra.mxu0 %v488_v3  ;;  %v480_v26 = vmax.f32 %v468_v19, 0.0 }
 0x1e0   : > { %v474_v25 = vadd.f32 %v473_v24, %v405_v20  ;;  %v481_v28 = vmax.f32 %v470_v21, 0.0 }
 0x1e1   : > { %v482_v27 = vmax.f32 %v472_v23, 0.0 }
 0x1e2   : > { %v483_v29 = vmax.f32 %v474_v25, 0.0 }
 0x1e3   : > { %v490_v30 = vpack.c.bf16 %v482_v27, %v480_v26 }
 0x1e4   : > { %v491_v31 = vpack.c.bf16 %v483_v29, %v481_v28 }
 0x1e6   : > { %526 = vmatprep.subr.bf16.mxu0 %v491_v31 }
 0x1e7   : > { %527 = vmatpush1.bf16.msra.mxu0 %v490_v30 }
 0x1ea   : > { %707 = vmatmul.mubr.msk.bf16.vlgmr.msra.gmra.mrb[4].mxu0 %vm315_vm0, %v754_v32 }
 0x1eb   : > { %566 = vmatprep.mubr.bf16.mxu0 %v780_v0  ;;  %v502_v0 = vpop.permute.xlu1 %501 }
 0x1ef   : > { %v506_v54 = vpop.permute.xlu1 %505 }
 0x1f2   : > { %708 = vmatmul.mubr.msk.bf16.gmra.mrb[8].mxu0 %vm315_vm0, %v755_v33 }
 0x2bd   : > { %v558_v35 = vpop.f32.mrb[4].mxu0 }
 0x2be   : > { %v559_v37 = vadd.f32 %v558_v35, %v494_v34  ;;  %v560_v38 = vpop.f32.mrb[5].mxu0 }
 0x2bf   : > { %v561_v39 = vadd.f32 %v560_v38, %v494_v34  ;;  %v562_v40 = vpop.f32.mrb[6].mxu0 }
 0x2c0   : > { %v577_v41 = vadd.f32 %v559_v37, %v869_v7  ;;  %v563_v42 = vadd.f32 %v562_v40, %v498_v36  ;;  %v564_v43 = vpop.f32.mrb[7].mxu0 }
 0x2c1   : > { %v578_v44 = vadd.f32 %v561_v39, %v865_v5  ;;  %v565_v45 = vadd.f32 %v564_v43, %v498_v36 }
 0x2c2   : > { %v585_v46 = vmax.f32 %v577_v41, 0.0  ;;  %v579_v47 = vadd.f32 %v563_v42, %v873_v9 }
 0x2c3   : > { %v586_v7 = vmax.f32 %v578_v44, 0.0  ;;  %v580_v48 = vadd.f32 %v565_v45, %v867_v6 }
 0x2c4   : > { %593 = vst [vmem:[%s933_s27] sm:$0xff] %v585_v46  ;;  %v587_v49 = vmax.f32 %v579_v47, 0.0 }
 0x2c5   : > { %594 = vst [vmem:[%s933_s27 + $0x8] sm:$0xff] %v586_v7  ;;  %v588_v50 = vmax.f32 %v580_v48, 0.0  ;;  %v568_v51 = vpop.f32.mrb[8].mxu0 }
 0x2c6   : > { %595 = vst [vmem:[%s933_s27 + $0x10] sm:$0xff] %v587_v49  ;;  %v569_v52 = vadd.f32 %v568_v51, %v502_v0  ;;  %v570_v53 = vpop.f32.mrb[9].mxu0 }
 0x2c7   : > { %596 = vst [vmem:[%s933_s27 + $0x18] sm:$0xff] %v588_v50  ;;  %v571_v5 = vadd.f32 %v570_v53, %v502_v0  ;;  %v572_v55 = vpop.f32.mrb[10].mxu0 }
 0x2c8   : > { %v581_v9 = vadd.f32 %v569_v52, %v885_v14  ;;  %v573_v56 = vadd.f32 %v572_v55, %v506_v54  ;;  %v574_v6 = vpop.f32.mrb[11].mxu0 }
 0x2c9   : > { %v582_v57 = vadd.f32 %v571_v5, %v875_v10  ;;  %v575_v58 = vadd.f32 %v574_v6, %v506_v54 }
 0x2ca   : > { %v589_v59 = vmax.f32 %v581_v9, 0.0  ;;  %v583_v60 = vadd.f32 %v573_v56, %v887_v15 }
 0x2cb   : > { %v590_v61 = vmax.f32 %v582_v57, 0.0  ;;  %v584_v62 = vadd.f32 %v575_v58, %v877_v11 }
 0x2cc   : > { %597 = vst [vmem:[%s933_s27 + $0x20] sm:$0xff] %v589_v59  ;;  %v591_v63 = vmax.f32 %v583_v60, 0.0 }
 0x2cd   : > { %598 = vst [vmem:[%s933_s27 + $0x28] sm:$0xff] %v590_v61  ;;  %v592_v8 = vmax.f32 %v584_v62, 0.0 }
 0x2ce   : > { %599 = vst [vmem:[%s933_s27 + $0x30] sm:$0xff] %v591_v63 }
 0x2cf   : > { %600 = vst [vmem:[%s933_s27 + $0x38] sm:$0xff] %v592_v8 }
 0x2d0 PF: > { %s15_s20 = sadd.s32 1, %s778_s20   ;;  %s965_s18 = smov %s774_s19 }
 0x2d1   : > { %p12_p5 = scmp.ge.s32.totalorder %s15_s20, 4   ;;  %s966_s19 = smov %s968_s21 }
 0x2d3   :  { %14 = sbr.rel (!%p12_p5) target bundleno = 2 (0x2), region = 70 }

</bundles_post_ra>
